<compile_context>
chip_gen: v7x
topology: tpu7x:2x2x1
jax: 0.10.0
libtpu: 0.0.40
codegen_flags: <defaults>
</compile_context>

<pallas_src>
import functools

import jax
import jax.numpy as jnp
from jax.experimental import pallas as pl
from jax.experimental.pallas import tpu as pltpu

LANE = 128
SUBLANE = 8


def _round_up(x, m):
    return (x + m - 1) // m * m


def fc_model_kernel(x_ref, w1_ref, b1_ref, w2_ref, b2_ref, w3_ref, b3_ref,
                    out_ref, *, valid_out, padded_out):
    # layer1 + ReLU (bf16 MXU inputs, f32 accumulation)
    h1 = jnp.dot(x_ref[...], w1_ref[...], preferred_element_type=jnp.float32)
    h1 = jnp.maximum(h1 + b1_ref[...], 0.0)

    # layer2 + ReLU
    h2 = jnp.dot(h1.astype(w2_ref.dtype), w2_ref[...],
                 preferred_element_type=jnp.float32)
    h2 = jnp.maximum(h2 + b2_ref[...], 0.0)

    # layer3
    logits = jnp.dot(h2.astype(w3_ref.dtype), w3_ref[...],
                     preferred_element_type=jnp.float32)
    logits = logits + b3_ref[...]

    # Mask lane-padding columns only when they exist (static decision), so
    # padded logits do not perturb the softmax.
    if valid_out != padded_out:
        col = jax.lax.broadcasted_iota(jnp.int32, logits.shape, 1)
        logits = jnp.where(col < valid_out, logits, jnp.float32(-1e30))

    # LogSoftmax over dim=1 (features), numerically stable.
    m = jnp.max(logits, axis=-1, keepdims=True)
    shifted = logits - m
    lse = jnp.log(jnp.sum(jnp.exp(shifted), axis=-1, keepdims=True))
    out_ref[...] = (shifted - lse).astype(out_ref.dtype)


def prepare_params(w1, b1, w2, b2, w3, b3, *, compute_dtype=jnp.bfloat16):
    """One-time param prep: lane-pad every feature dim to a multiple of 128
    and cast weights to the MXU compute dtype.  Call once at init time, NOT
    per forward (avoids re-reading + re-writing every weight in HBM)."""
    in_size, h1_size = w1.shape
    h2_size = w2.shape[1]
    out_size = w3.shape[1]
    in_p = _round_up(in_size, LANE)
    h1_p = _round_up(h1_size, LANE)
    h2_p = _round_up(h2_size, LANE)
    out_p = _round_up(out_size, LANE)

    def pad2(a, rows, cols, dtype):
        return jnp.pad(a, ((0, rows - a.shape[0]),
                           (0, cols - a.shape[1]))).astype(dtype)

    return dict(
        w1=pad2(w1, in_p, h1_p, compute_dtype),
        b1=pad2(b1, 1, h1_p, jnp.float32),
        w2=pad2(w2, h1_p, h2_p, compute_dtype),
        b2=pad2(b2, 1, h2_p, jnp.float32),
        w3=pad2(w3, h2_p, out_p, compute_dtype),
        b3=pad2(b3, 1, out_p, jnp.float32),
        in_size=in_size, out_size=out_size,
        in_p=in_p, h1_p=h1_p, h2_p=h2_p, out_p=out_p,
        compute_dtype=compute_dtype,
    )


def _vmem_capacity_bytes():
    """Per-generation VMEM capacity (128 MiB v5e/v6e, 64 MiB per-TC v7x)."""
    try:
        return int(pltpu.get_tpu_info().vmem_capacity_bytes)
    except Exception:
        return 64 * 1024 * 1024  # conservative fallback (v7x per-TC)


def _pick_tile_m(batch_p, p, tile_m, vmem_budget):
    """VMEM-aware batch tile: multiple of 8, >=2 grid steps when possible,
    shrunk until the estimated footprint fits the budget."""
    bytes_c = jnp.dtype(p["compute_dtype"]).itemsize

    tile_m = min(tile_m, batch_p)
    tile_m = max(SUBLANE, _round_up(tile_m, SUBLANE))
    # >=2 grid steps when the batch allows it: shards across v7x's 2 TCs and
    # lets BlockSpec pipelining overlap x/out DMA with compute.
    if batch_p > SUBLANE and pl.cdiv(batch_p, tile_m) < 2:
        tile_m = max(SUBLANE, _round_up(pl.cdiv(batch_p, 2), SUBLANE))

    # Resident (single-buffered) weights + biases.
    w_bytes = (p["in_p"] * p["h1_p"] + p["h1_p"] * p["h2_p"]
               + p["h2_p"] * p["out_p"]) * bytes_c
    w_bytes += (p["h1_p"] + p["h2_p"] + p["out_p"]) * 4

    def tile_bytes(tm):
        x_io = 2 * tm * p["in_p"] * bytes_c          # double-buffered x tiles
        o_io = 2 * tm * p["out_p"] * 4               # double-buffered out tiles
        inter = tm * (p["h1_p"] + p["h2_p"] + p["out_p"]) * 4  # f32 intermediates
        return x_io + o_io + inter

    while tile_m > SUBLANE and w_bytes + tile_bytes(tile_m) > vmem_budget:
        tile_m = max(SUBLANE, _round_up(tile_m // 2, SUBLANE))
    return tile_m


def fc_model_forward(x, params, *, tile_m=512):
    """Forward pass.  `params` must come from prepare_params()."""
    p = params
    batch, in_size = x.shape
    assert in_size == p["in_size"]
    compute_dtype = p["compute_dtype"]

    # Pad the batch only to a sublane multiple (8), never to a full tile_m
    # multiple; a possible tail tile is handled by grid=cdiv.
    batch_p = _round_up(batch, SUBLANE)

    capacity = _vmem_capacity_bytes()
    vmem_limit = max(32 * 1024 * 1024, (capacity * 3) // 4)
    tile_m = _pick_tile_m(batch_p, p, tile_m, int(vmem_limit * 0.8))

    # Only the activations are padded / cast per call — and only if needed.
    if x.shape != (batch_p, p["in_p"]) or x.dtype != compute_dtype:
        xp = jnp.pad(x, ((0, batch_p - batch),
                         (0, p["in_p"] - in_size))).astype(compute_dtype)
    else:
        xp = x

    grid = (pl.cdiv(batch_p, tile_m),)

    # Constant-index weights/biases: DMA'd into VMEM once, single-buffered
    # (no pointless double-buffer of data that never changes).
    def resident(shape):
        return pl.BlockSpec(shape, lambda i: (0, 0),
                            pipeline_mode=pl.Buffered(buffer_count=1))

    out = pl.pallas_call(
        functools.partial(fc_model_kernel,
                          valid_out=p["out_size"], padded_out=p["out_p"]),
        out_shape=jax.ShapeDtypeStruct((batch_p, p["out_p"]), jnp.float32),
        grid=grid,
        in_specs=[
            pl.BlockSpec((tile_m, p["in_p"]), lambda i: (i, 0)),
            resident(p["w1"].shape), resident(p["b1"].shape),
            resident(p["w2"].shape), resident(p["b2"].shape),
            resident(p["w3"].shape), resident(p["b3"].shape),
        ],
        out_specs=pl.BlockSpec((tile_m, p["out_p"]), lambda i: (i, 0)),
        compiler_params=pltpu.CompilerParams(
            dimension_semantics=("parallel",),
            vmem_limit_bytes=int(vmem_limit),
        ),
    )(xp, p["w1"], p["b1"], p["w2"], p["b2"], p["w3"], p["b3"])

    # Strip batch / lane padding back to the logical output shape.
    return out[:batch, :p["out_size"]]


def init_params(key, input_size, hidden_size, output_size):
    """Deterministic init mimicking nn.Linear (uniform +/- 1/sqrt(fan_in)).
    Weights stored as (in_features, out_features); biases as (1, out)."""
    dims = [input_size, hidden_size[0], hidden_size[1], output_size]
    params = []
    for i in range(3):
        fan_in, fan_out = dims[i], dims[i + 1]
        key, kw, kb = jax.random.split(key, 3)
        bound = 1.0 / jnp.sqrt(fan_in)
        w = jax.random.uniform(kw, (fan_in, fan_out), jnp.float32,
                               minval=-bound, maxval=bound)
        b = jax.random.uniform(kb, (1, fan_out), jnp.float32,
                               minval=-bound, maxval=bound)
        params += [w, b]
    return params


def reference_forward(x, w1, b1, w2, b2, w3, b3):
    h1 = jnp.maximum(x @ w1 + b1, 0.0)
    h2 = jnp.maximum(h1 @ w2 + b2, 0.0)
    logits = h2 @ w3 + b3
    return jax.nn.log_softmax(logits, axis=1)


if __name__ == "__main__":
    # Small shapes consistent with the module's forward (2-D input: batch x features).
    batch = 32
    input_size = 32
    hidden_size = (64, 32)
    output_size = 16

    key = jax.random.PRNGKey(0)
    key, kx = jax.random.split(key)
    x = jax.random.normal(kx, (batch, input_size), jnp.float32)

    w1, b1, w2, b2, w3, b3 = init_params(key, input_size, hidden_size,
                                         output_size)

    # One-time weight prep (pad + bf16 cast) — NOT repeated per forward.
    prepared = prepare_params(w1, b1, w2, b2, w3, b3)

    out = fc_model_forward(x, prepared)   # tile_m auto-clamped -> 2-step grid
    out = jax.block_until_ready(out)

    ref = reference_forward(x, w1, b1, w2, b2, w3, b3)
    assert out.shape == (batch, output_size)
    # bf16 MXU inputs (f32 accumulation) -> relax tolerance vs f32 reference.
    assert jnp.allclose(out, ref, atol=5e-2, rtol=5e-2), (
        float(jnp.max(jnp.abs(out - ref))))

    print("KERNEL_OK")
</pallas_src>

<mosaic_0001>
module attributes {stable_mosaic.version = 11 : i64} {
  func.func @fc_model_kernel(%arg0: i32, %arg1: memref<16x128xbf16, #tpu.memory_space<vmem>>, %arg2: memref<128x128xbf16, #tpu.memory_space<vmem>>, %arg3: memref<1x128xf32, #tpu.memory_space<vmem>>, %arg4: memref<128x128xbf16, #tpu.memory_space<vmem>>, %arg5: memref<1x128xf32, #tpu.memory_space<vmem>>, %arg6: memref<128x128xbf16, #tpu.memory_space<vmem>>, %arg7: memref<1x128xf32, #tpu.memory_space<vmem>>, %arg8: memref<16x128xf32, #tpu.memory_space<vmem>>) attributes {dimension_semantics = [#tpu.dimension_semantics<parallel>], iteration_bounds = array<i64: 2>, scalar_prefetch = 0 : i64, scratch_operands = 0 : i64, tpu.core_type = #tpu.core_type<tc>, window_params = [{transform_indices = @transform_0, window_bounds = array<i64: 16, 128>}, {pipeline_mode = #tpu.pipeline_mode<synchronous>, transform_indices = @transform_1, window_bounds = array<i64: 128, 128>}, {pipeline_mode = #tpu.pipeline_mode<synchronous>, transform_indices = @transform_2, window_bounds = array<i64: 1, 128>}, {pipeline_mode = #tpu.pipeline_mode<synchronous>, transform_indices = @transform_3, window_bounds = array<i64: 128, 128>}, {pipeline_mode = #tpu.pipeline_mode<synchronous>, transform_indices = @transform_4, window_bounds = array<i64: 1, 128>}, {pipeline_mode = #tpu.pipeline_mode<synchronous>, transform_indices = @transform_5, window_bounds = array<i64: 128, 128>}, {pipeline_mode = #tpu.pipeline_mode<synchronous>, transform_indices = @transform_6, window_bounds = array<i64: 1, 128>}, {transform_indices = @transform_7, window_bounds = array<i64: 16, 128>}]} {
    %c0 = arith.constant 0 : index
    %c0_0 = arith.constant 0 : index
    %0 = vector.load %arg1[%c0, %c0_0] : memref<16x128xbf16, #tpu.memory_space<vmem>>, vector<16x128xbf16>
    %c0_1 = arith.constant 0 : index
    %c0_2 = arith.constant 0 : index
    %1 = vector.load %arg2[%c0_1, %c0_2] : memref<128x128xbf16, #tpu.memory_space<vmem>>, vector<128x128xbf16>
    %cst = arith.constant dense<0.000000e+00> : vector<16x128xf32>
    %2 = tpu.matmul %0, %1, %cst {dimension_numbers = #tpu.dot_dimension_numbers<[1], [0], [0], [1], [0, 0, 1, 1], [], []>} : vector<16x128xbf16>, vector<128x128xbf16>, vector<16x128xf32> -> vector<16x128xf32>
    %c0_3 = arith.constant 0 : index
    %c0_4 = arith.constant 0 : index
    %3 = vector.load %arg3[%c0_3, %c0_4] : memref<1x128xf32, #tpu.memory_space<vmem>>, vector<1x128xf32>
    %4 = vector.broadcast %3 : vector<1x128xf32> to vector<16x128xf32>
    %5 = arith.addf %2, %4 : vector<16x128xf32>
    %cst_5 = arith.constant 0.000000e+00 : f32
    %6 = vector.broadcast %cst_5 : f32 to vector<16x128xf32>
    %7 = arith.maximumf %5, %6 : vector<16x128xf32>
    %8 = arith.truncf %7 : vector<16x128xf32> to vector<16x128xbf16>
    %c0_6 = arith.constant 0 : index
    %c0_7 = arith.constant 0 : index
    %9 = vector.load %arg4[%c0_6, %c0_7] : memref<128x128xbf16, #tpu.memory_space<vmem>>, vector<128x128xbf16>
    %cst_8 = arith.constant dense<0.000000e+00> : vector<16x128xf32>
    %10 = tpu.matmul %8, %9, %cst_8 {dimension_numbers = #tpu.dot_dimension_numbers<[1], [0], [0], [1], [0, 0, 1, 1], [], []>} : vector<16x128xbf16>, vector<128x128xbf16>, vector<16x128xf32> -> vector<16x128xf32>
    %c0_9 = arith.constant 0 : index
    %c0_10 = arith.constant 0 : index
    %11 = vector.load %arg5[%c0_9, %c0_10] : memref<1x128xf32, #tpu.memory_space<vmem>>, vector<1x128xf32>
    %12 = vector.broadcast %11 : vector<1x128xf32> to vector<16x128xf32>
    %13 = arith.addf %10, %12 : vector<16x128xf32>
    %cst_11 = arith.constant 0.000000e+00 : f32
    %14 = vector.broadcast %cst_11 : f32 to vector<16x128xf32>
    %15 = arith.maximumf %13, %14 : vector<16x128xf32>
    %16 = arith.truncf %15 : vector<16x128xf32> to vector<16x128xbf16>
    %c0_12 = arith.constant 0 : index
    %c0_13 = arith.constant 0 : index
    %17 = vector.load %arg6[%c0_12, %c0_13] : memref<128x128xbf16, #tpu.memory_space<vmem>>, vector<128x128xbf16>
    %cst_14 = arith.constant dense<0.000000e+00> : vector<16x128xf32>
    %18 = tpu.matmul %16, %17, %cst_14 {dimension_numbers = #tpu.dot_dimension_numbers<[1], [0], [0], [1], [0, 0, 1, 1], [], []>} : vector<16x128xbf16>, vector<128x128xbf16>, vector<16x128xf32> -> vector<16x128xf32>
    %c0_15 = arith.constant 0 : index
    %c0_16 = arith.constant 0 : index
    %19 = vector.load %arg7[%c0_15, %c0_16] : memref<1x128xf32, #tpu.memory_space<vmem>>, vector<1x128xf32>
    %20 = vector.broadcast %19 : vector<1x128xf32> to vector<16x128xf32>
    %21 = arith.addf %18, %20 : vector<16x128xf32>
    %22 = tpu.iota {dimensions = array<i32: 1>} : vector<16x128xi32>
    %c16_i32 = arith.constant 16 : i32
    %23 = vector.broadcast %c16_i32 : i32 to vector<16x128xi32>
    %24 = arith.cmpi slt, %22, %23 : vector<16x128xi32>
    %cst_17 = arith.constant -1.000000e+30 : f32
    %25 = vector.broadcast %cst_17 : f32 to vector<16x128xf32>
    %26 = arith.select %24, %21, %25 : vector<16x128xi1>, vector<16x128xf32>
    %cst_18 = arith.constant dense<0xFF800000> : vector<16xf32>
    %27 = vector.multi_reduction <maximumf>, %26, %cst_18 [1] : vector<16x128xf32> to vector<16xf32>
    %28 = vector.shape_cast %27 : vector<16xf32> to vector<16x1xf32>
    %29 = vector.broadcast %28 : vector<16x1xf32> to vector<16x128xf32>
    %30 = arith.subf %26, %29 : vector<16x128xf32>
    %31 = math.exp %30 : vector<16x128xf32>
    %cst_19 = arith.constant dense<0.000000e+00> : vector<16xf32>
    %32 = vector.multi_reduction <add>, %31, %cst_19 [1] : vector<16x128xf32> to vector<16xf32>
    %33 = vector.shape_cast %32 : vector<16xf32> to vector<16x1xf32>
    %34 = math.log %33 : vector<16x1xf32>
    %35 = vector.broadcast %34 : vector<16x1xf32> to vector<16x128xf32>
    %36 = arith.subf %30, %35 : vector<16x128xf32>
    %c0_20 = arith.constant 0 : index
    %c0_21 = arith.constant 0 : index
    %37 = vector.load %arg8[%c0_20, %c0_21] : memref<16x128xf32, #tpu.memory_space<vmem>>, vector<16x128xf32>
    tpu.vector_store %arg8[%c0_20, %c0_21], %36 {strides = array<i32>} : memref<16x128xf32, #tpu.memory_space<vmem>>, vector<16x128xf32>,
    return
  }
  func.func @transform_0(%arg0: i32) -> (i32, i32) {
    %c0_i32 = arith.constant 0 : i32
    %c0_i32_0 = arith.constant 0 : i32
    return %arg0, %c0_i32 : i32, i32
  }
  func.func @transform_1(%arg0: i32) -> (i32, i32) {
    %c0_i32 = arith.constant 0 : i32
    %c0_i32_0 = arith.constant 0 : i32
    %c0_i32_1 = arith.constant 0 : i32
    return %c0_i32, %c0_i32_0 : i32, i32
  }
  func.func @transform_2(%arg0: i32) -> (i32, i32) {
    %c0_i32 = arith.constant 0 : i32
    %c0_i32_0 = arith.constant 0 : i32
    %c0_i32_1 = arith.constant 0 : i32
    return %c0_i32, %c0_i32_0 : i32, i32
  }
  func.func @transform_3(%arg0: i32) -> (i32, i32) {
    %c0_i32 = arith.constant 0 : i32
    %c0_i32_0 = arith.constant 0 : i32
    %c0_i32_1 = arith.constant 0 : i32
    return %c0_i32, %c0_i32_0 : i32, i32
  }
  func.func @transform_4(%arg0: i32) -> (i32, i32) {
    %c0_i32 = arith.constant 0 : i32
    %c0_i32_0 = arith.constant 0 : i32
    %c0_i32_1 = arith.constant 0 : i32
    return %c0_i32, %c0_i32_0 : i32, i32
  }
  func.func @transform_5(%arg0: i32) -> (i32, i32) {
    %c0_i32 = arith.constant 0 : i32
    %c0_i32_0 = arith.constant 0 : i32
    %c0_i32_1 = arith.constant 0 : i32
    return %c0_i32, %c0_i32_0 : i32, i32
  }
  func.func @transform_6(%arg0: i32) -> (i32, i32) {
    %c0_i32 = arith.constant 0 : i32
    %c0_i32_0 = arith.constant 0 : i32
    %c0_i32_1 = arith.constant 0 : i32
    return %c0_i32, %c0_i32_0 : i32, i32
  }
  func.func @transform_7(%arg0: i32) -> (i32, i32) {
    %c0_i32 = arith.constant 0 : i32
    %c0_i32_0 = arith.constant 0 : i32
    return %arg0, %c0_i32 : i32, i32
  }
}

</mosaic_0001>

<bundles_post_ra>
// kernel: tpu_custom_call.1
= control target key start
LH: loop header
LB: loop body
LE: loop exit
PB: predicated region body
PF: predicated region fallthrough
CT: control target
= control target key end

     0   :  { %12 = vsyncpa [#allocation3], 0  ;;  %s1645_s0 = inlined_call_operand.hbm [shape: bf16[32,128], index: 0, kind: input, shape index: {}]   ;;  %s1646_s1 = inlined_call_operand.hbm [shape: bf16[128,128], index: 1, kind: input, shape index: {}]   ;;  %s1647_s2 = inlined_call_operand.vmem [shape: f32[1,128], index: 2, kind: input, shape index: {}]   ;;  %s1648_s3 = inlined_call_operand.hbm [shape: bf16[128,128], index: 3, kind: input, shape index: {}]   ;;  %s1649_s4 = inlined_call_operand.vmem [shape: f32[1,128], index: 4, kind: input, shape index: {}]   ;;  %s1650_s5 = inlined_call_operand.hbm [shape: bf16[128,128], index: 5, kind: input, shape index: {}]   ;;  %s1651_s6 = inlined_call_operand.vmem [shape: f32[1,128], index: 6, kind: input, shape index: {}]   ;;  %s1652_s7 = inlined_call_operand.hbm [shape: f32[32,128], index: 7, kind: output, shape index: {}]  }
   0x1   :  { %14 = vsyncpa [#allocation3 + $0x1], 0 }
   0x2   :  { %15 = vsyncpa [#allocation6], 0 }
   0x3   :  { %16 = vsyncpa [#allocation9], 0 }
   0x4   :  { %17 = vsyncpa [#allocation4], 0 }
   0x5   :  { %19 = vsyncpa [#allocation4 + $0x1], 0  ;;  %s1331_s24 = smov 0   ;;  %s1333_s25 = smov 0  }
   0x6   :  { %s1335_s26 = smov 0   ;;  %s1337_s27 = smov 0  }
   0x7 LB: > { %s1352_s28 = sadd.s32 4294967295, %s1278_s27   ;;  %s837_s29 = sadd.s32 4294967294, %s1278_s27   ;;  %s1278_s27 = sphi %s1337_s27, %s1678_s27   ;;  %s1274_s26 = sphi %s1335_s26, %s1677_s26   ;;  %s1270_s25 = sphi %s1333_s25, %s1676_s25   ;;  %s1266_s24 = sphi %s1331_s24, %s1675_s24  }
   0x8   : > { %p45_p0 = scmp.ne.s32.totalorder %s1270_s25, %s1266_s24  ;;  %p1653_p1 = scmp.eq.s32.totalorder %s1352_s28, 0 }
   0x9   : > { %p201_p3 = scmp.eq.s32.totalorder %s837_s29, 1  ;;  %p838_p5 = scmp.ge.s32.totalorder %s1278_s27, 1 }
   0xa   : > { %p1361_p4 = por %p1653_p1, %p45_p0  ;;  %p208_p7 = scmp.lt.s32.totalorder %s1278_s27, 3 }
   0xb   : > { %p1366_p6 = por %p201_p3, %p45_p0  ;;  %s1280_s10 = smov [#allocation5]  }
   0xc   : > { %s1657_s30 = scalar_select %p1361_p4, 1, 0 }
   0xd   : > { %s1658_s8 = scalar_select %p1366_p6, 1, 0 }
   0xe   : > { %p1371_p8 = pnand %p838_p5, %p208_p7  ;;  %s220_s11 = sshll.u32 %s1280_s10, 4  ;;  %s1375_s11 = int_to_ptr.vmem [resolvable:$true] %s220_s11 }
   0xf   : > { %1659 = sst [smem:[#allocation15_spill]] %s1658_s8  ;;  %s1281_s13 = smov [#allocation7]  }
  0x10   : > { %s1660_s9 = scalar_select %p1371_p8, 1, 0 }
  0x11   : > { %p990_p9 = pneg %p1371_p8  ;;  %s236_s14 = sshll.u32 %s1281_s13, 4  ;;  %s1386_s14 = int_to_ptr.vmem [resolvable:$true] %s236_s14 }
  0x12   : > { %s1282_s15 = smov [#allocation8]   ;;  %s1090_s19 = scalar_lea.hbm %s1646_s1, 1024 }
  0x13   : > { %p1382_p11 = pnand %p990_p9, %p1653_p1  ;;  %s1388_s16 = sshll.u32 %s1282_s15, 4  ;;  %s253_s16 = int_to_ptr.vmem [resolvable:$true] %s1388_s16 }
  0x14   : > { %p1091_p12 = scmp.ne.s32.totalorder %s1646_s1, %s1090_s19  ;;  %p1097_p5 = scmp.lt.u32.totalorder %s1090_s19, %s1646_s1 }
  0x15   : > { %p1398_p13 = pneg %p1382_p11 }
  0x17   : > { %p1093_p0 = pnand %p1398_p13, %p1091_p12 }
  0x19   : > { %p1094_p3 = pneg %p1093_p0 }
  0x1b   : > { %p1099_p7 = pnand %p1097_p5, %p1094_p3 }
  0x1d   : > { %1102 = shalt.err (!%p1099_p7)
}
  0x1e   : > { %s1103_s10 = scalar_lea.vmem %s1375_s11, 1024  ;;  %p1111_p2 = scmp.lt.s32.totalorder %s1375_s11, %s1375_s11 }
  0x1f   : > { %p1104_p9 = scmp.ne.s32.totalorder %s1375_s11, %s1103_s10  ;;  %p1112_p6 = scmp.lt.s32.totalorder %s1103_s10, %s1103_s10 }
  0x21   : > { %p1106_p10 = pnand %p1104_p9, %p1398_p13  ;;  %p1113_p12 = por %p1112_p6, %p1111_p2 }
  0x23   : > { %p1107_p1 = pneg %p1106_p10 }
  0x25   : > { %p1114_p0 = pnand %p1113_p12, %p1107_p1 }
  0x27   : > { %1117 = shalt.err (!%p1114_p0)
}
  0x28   : > { %s1283_s13 = smov 64   ;;  %s1284_s15 = smov 4  }
  0x29   : > { %993 = dma.hbm_to_vmem [thread:$0]  (!%p1382_p11), %s1646_s1, 1024, %s1375_s11, [#allocation6], %s1283_s13, %s1283_s13, %s1284_s15  }
  0x2a   : > { %s1118_s21 = scalar_lea.hbm %s1648_s3, 1024 }
  0x2b   : > { %p1119_p1 = scmp.ne.s32.totalorder %s1648_s3, %s1118_s21  ;;  %p1125_p10 = scmp.lt.u32.totalorder %s1118_s21, %s1648_s3 }
  0x2d   : > { %p1121_p2 = pnand %p1119_p1, %p1398_p13 }
  0x2f   : > { %p1122_p6 = pneg %p1121_p2 }
  0x31   : > { %p1127_p3 = pnand %p1125_p10, %p1122_p6 }
  0x33   : > { %1130 = shalt.err (!%p1127_p3)
}
  0x34   : > { %s1131_s11 = scalar_lea.vmem %s1386_s14, 1024  ;;  %p1139_p12 = scmp.lt.s32.totalorder %s1386_s14, %s1386_s14 }
  0x35   : > { %p1132_p5 = scmp.ne.s32.totalorder %s1386_s14, %s1131_s11  ;;  %p1140_p0 = scmp.lt.s32.totalorder %s1131_s11, %s1131_s11 }
  0x37   : > { %p1134_p7 = pnand %p1132_p5, %p1398_p13  ;;  %p1141_p1 = por %p1140_p0, %p1139_p12 }
  0x39   : > { %p1135_p9 = pneg %p1134_p7 }
  0x3b   : > { %p1142_p2 = pnand %p1141_p1, %p1135_p9 }
  0x3d   : > { %1145 = shalt.err (!%p1142_p2)
}
  0x3e   : > { %996 = dma.hbm_to_vmem [thread:$0]  (!%p1382_p11), %s1648_s3, 1024, %s1386_s14, [#allocation6], %s1283_s13, %s1283_s13, %s1284_s15  }
  0x3f   : > { %s1146_s20 = scalar_lea.hbm %s1650_s5, 1024 }
  0x40   : > { %p1147_p6 = scmp.ne.s32.totalorder %s1650_s5, %s1146_s20  ;;  %p1153_p5 = scmp.lt.u32.totalorder %s1146_s20, %s1650_s5 }
  0x42   : > { %p1149_p10 = pnand %p1147_p6, %p1398_p13 }
  0x44   : > { %p1150_p3 = pneg %p1149_p10 }
  0x46   : > { %p1155_p7 = pnand %p1153_p5, %p1150_p3 }
  0x48   : > { %1158 = shalt.err (!%p1155_p7)
}
  0x49   : > { %s1159_s11 = scalar_lea.vmem %s253_s16, 1024  ;;  %p1167_p1 = scmp.lt.s32.totalorder %s253_s16, %s253_s16 }
  0x4a   : > { %p1160_p9 = scmp.ne.s32.totalorder %s253_s16, %s1159_s11  ;;  %p1168_p2 = scmp.lt.s32.totalorder %s1159_s11, %s1159_s11 }
  0x4c   : > { %p1162_p12 = pnand %p1160_p9, %p1398_p13  ;;  %p1169_p4 = por %p1168_p2, %p1167_p1 }
  0x4e   : > { %p1163_p0 = pneg %p1162_p12 }
  0x50   : > { %p1170_p8 = pnand %p1169_p4, %p1163_p0 }
  0x52   : > { %1173 = shalt.err (!%p1170_p8)
}
  0x53   : > { %999 = dma.hbm_to_vmem [thread:$0]  (!%p1382_p11), %s1650_s5, 1024, %s253_s16, [#allocation9], %s1283_s13, %s1283_s13, %s1284_s15  }
  0x54   : > { %s1471_s22 = sadd.s32 1, %s1278_s27   ;;  %s32_s17 = sadd.s32 1, %s1274_s26 }
  0x55   : > { %s29_s12 = ssub.s32 %s1278_s27, %s1471_s22  ;;  %p39_p8 = scmp.ne.s32.totalorder %s1274_s26, %s1270_s25 }
  0x56   : > { %p30_p4 = scmp.eq.s32.totalorder %s29_s12, 0  ;;  %p40_p13 = scmp.eq.s32.totalorder %s1278_s27, 0 }
  0x57   : > { %p1011_p6 = scmp.lt.s32.totalorder %s1278_s27, 2  ;;  %p1663_p3 = scmp.eq.s32.totalorder %s1352_s28, 1 }
  0x58   : > { %s1481_s18 = scalar_select %p30_p4, %s1274_s26, %s32_s17  }
  0x59   : > { %p41_p10 = por %p40_p13, %p39_p8  ;;  %p1485_p5 = por %p1663_p3, %p39_p8 }
  0x5a   : > { %s269_s20 = sand.u32 1, %s1274_s26   ;;  %s885_s21 = sshll.u32 %s1278_s27, 7 }
  0x5b   : > { %s843_s16 = sshll.u32 %s269_s20, 3  ;;  %s1494_s10 = scalar_lea.hbm %s1645_s0, %s885_s21 }
  0x5c   : > { %s273_s11 = scalar_lea.vmem [#allocation2], %s843_s16  ;;  %p1496_p11 = pnand %p1011_p6, %p41_p10 }
  0x5d   : > { %s280_s14 = sshll.u32 %s273_s11, 4  ;;  %s1502_s12 = scalar_lea.sflag [#allocation3], %s269_s20  ;;  %s1500_s14 = int_to_ptr.vmem [resolvable:$true] %s280_s14 }
  0x5e   : > { %s1174_s17 = scalar_lea.hbm %s1494_s10, 128  ;;  %p1176_p9 = pneg %p1496_p11 }
  0x5f   : > { %p1175_p7 = scmp.ne.s32.totalorder %s1494_s10, %s1174_s17  ;;  %s1179_s23 = scalar_lea.hbm %s1645_s0, 256 }
  0x60   : > { %p1180_p1 = scmp.lt.u32.totalorder %s1494_s10, %s1645_s0  ;;  %p1181_p2 = scmp.lt.u32.totalorder %s1179_s23, %s1174_s17 }
  0x61   : > { %p1177_p12 = pnand %p1176_p9, %p1175_p7  ;;  %p1183_p8 = scmp.lt.u32.totalorder %s1174_s17, %s1494_s10 }
  0x62   : > { %p1182_p4 = por %p1181_p2, %p1180_p1 }
  0x63   : > { %p1178_p0 = pneg %p1177_p12 }
  0x64   : > { %p1184_p13 = por %p1183_p8, %p1182_p4 }
  0x66   : > { %p1185_p6 = pnand %p1184_p13, %p1178_p0 }
  0x68   : > { %1188 = shalt.err (!%p1185_p6)
}
  0x69   : > { %s1189_s20 = scalar_lea.vmem %s1500_s14, 128  ;;  %s1285_s21 = smov [#allocation2]  }
  0x6a   : > { %p1190_p10 = scmp.ne.s32.totalorder %s1500_s14, %s1189_s20  ;;  %s1194_s16 = sshll.u32 %s1285_s21, 4  ;;  %s1195_s16 = int_to_ptr.vmem [resolvable:$false] %s1194_s16 }
  0x6b   : > { %s1196_s29 = scalar_lea.vmem %s1195_s16, 256  ;;  %p1197_p12 = scmp.lt.s32.totalorder %s1500_s14, %s1195_s16 }
  0x6c   : > { %p1192_p3 = pnand %p1190_p10, %p1176_p9  ;;  %p1198_p1 = scmp.lt.s32.totalorder %s1196_s29, %s1189_s20 }
  0x6e   : > { %p1193_p7 = pneg %p1192_p3  ;;  %p1199_p2 = por %p1198_p1, %p1197_p12 }
  0x70   : > { %p1200_p4 = pnand %p1199_p2, %p1193_p7 }
  0x72   : > { %1203 = shalt.err (!%p1200_p4)
}
  0x73   : > { %1003 = dma.hbm_to_vmem [thread:$0]  (!%p1496_p11), %s1494_s10, 128, %s1500_s14, %s1502_s12, %s1283_s13, %s1283_s13, %s1284_s15  }
  0x74   : > { %p1666_p9 = scmp.ne.s32.totalorder %s1660_s9, 0 }
  0x75   : > { %s1536_s17 = sand.u32 (!%p1666_p9), 1, %s1270_s25   ;;  %p1667_p0 = scmp.ne.s32.totalorder (!%p1666_p9), %s1657_s30, 0 }
  0x76   : > { %292 = sbr.rel (%p1666_p9) target bundleno = 1155 (0x483), region = 48  ;;  %s847_s23 = sshll.u32 (!%p1666_p9), %s1536_s17, 3 }
  0x77   : > { %s295_s11 = scalar_lea.sflag (!%p1666_p9), [#allocation3], %s1536_s17  ;;  %s1540_s20 = scalar_lea.vmem (!%p1666_p9), [#allocation2], %s847_s23 }
  0x7d   : > { %1249 = dma.done.wait (%p1667_p0), %s295_s11, 128  }
  0x7e   : > { %1251 = vsyncadd (%p1667_p0), %s295_s11, 4294967168  ;;  %p1668_p11 = scmp.eq.s32.totalorder %s1352_s28, 0 }
  0x80   : > { %1253 = dma.done.wait (%p1668_p11), [#allocation6], 2048   ;;  %p1669_p8 = pmov %p1668_p11 }
  0x82   : > { %1255 = vsyncadd (%p1669_p8), [#allocation6], 4294965248  ;;  %p1670_p13 = pmov %p1669_p8 }
  0x83   : > { %p1671_p6 = pmov %p1669_p8 }
  0x84   : > { %1257 = dma.done.wait (%p1670_p13), [#allocation9], 1024  }
  0x85   : > { %1259 = vsyncadd (%p1671_p6), [#allocation9], 4294966272  ;;  %v1286_v0 = vmov 0.0   ;;  %vm1287_vm0 = vmmov 0   ;;  %v1057_v1 = vld [vmem:[#allocation5] sm:$0xff]   ;;  %v1058_v2 = vld [vmem:[#allocation5 + $0x8] sm:$0xff]   ;;  %v694_v46 = vlaneseq }
  0x86   : > { %914 = vmatprep.subr.bf16.mxu0 %v1286_v0  ;;  %930 = vmatprep.mubr.msk.bf16.mxu0 %vm1287_vm0, %v1286_v0  ;;  %v1059_v3 = vld [vmem:[#allocation5 + $0x10] sm:$0xff]   ;;  %v1066_v4 = vld [vmem:[#allocation7] sm:$0xff]   ;;  %v1060_v5 = vld [vmem:[#allocation5 + $0x18] sm:$0xff]   ;;  %s851_s8 = sshll.u32 %s1536_s17, 4  ;;  %s886_s16 = sshll.u32 %s1352_s28, 8 }
  0x87   : > { %934 = vmatprep.subr.bf16.mxu1 %v1286_v0  ;;  %950 = vmatprep.mubr.msk.bf16.mxu1 %vm1287_vm0, %v1286_v0  ;;  %v1067_v6 = vld [vmem:[#allocation7 + $0x8] sm:$0xff]   ;;  %v1061_v7 = vld [vmem:[#allocation5 + $0x20] sm:$0xff]   ;;  %v1068_v8 = vld [vmem:[#allocation7 + $0x10] sm:$0xff]   ;;  %v695_v47 = vand.u32 127, %v694_v46  ;;  %s340_s12 = scalar_lea.vmem [#allocation10], %s851_s8  ;;  %s1601_s11 = scalar_lea.hbm %s1652_s7, %s886_s16 }
  0x88   : > { %915 = vmatpush3.bf16.msra.mxu0 %v1057_v1  ;;  %935 = vmatpush3.bf16.msra.mxu1 %v1066_v4  ;;  %v1062_v9 = vld [vmem:[#allocation5 + $0x28] sm:$0xff]   ;;  %v1069_v10 = vld [vmem:[#allocation7 + $0x18] sm:$0xff]   ;;  %v1063_v11 = vld [vmem:[#allocation5 + $0x30] sm:$0xff]   ;;  %s735_s21 = sshll.u32 %s340_s12, 4  ;;  %s1288_s28 = smov [#allocation10]   ;;  %s1596_s21 = int_to_ptr.vmem [resolvable:$true] %s735_s21 }
  0x89   : > { %916 = vmatprep.subr.bf16.mxu0 %v1286_v0  ;;  %936 = vmatprep.subr.bf16.mxu1 %v1286_v0  ;;  %v1070_v12 = vld [vmem:[#allocation7 + $0x20] sm:$0xff]   ;;  %v1064_v13 = vld [vmem:[#allocation5 + $0x38] sm:$0xff]   ;;  %v1071_v14 = vld [vmem:[#allocation7 + $0x28] sm:$0xff]   ;;  %vm696_vm1 = vcmp.lt.s32.totalorder %v695_v47, 16  ;;  %s1204_s30 = scalar_lea.vmem %s1596_s21, 256  ;;  %s1208_s9 = sshll.u32 %s1288_s28, 4  ;;  %s1209_s9 = int_to_ptr.vmem [resolvable:$false] %s1208_s9 }
  0x8a   : > { %v1065_v15 = vld [vmem:[%s1540_s20] sm:$0xff]   ;;  %v1074_v18 = vld [vmem:[#allocation8] sm:$0xff]   ;;  %v1075_v19 = vld [vmem:[#allocation8 + $0x8] sm:$0xff]   ;;  %s722_s20 = scalar_lea.sflag [#allocation4], %s1536_s17  ;;  %p1205_p10 = scmp.ne.s32.totalorder %s1596_s21, %s1204_s30 }
  0x8b   : > { %v1072_v16 = vld [vmem:[#allocation7 + $0x30] sm:$0xff]   ;;  %v1073_v17 = vld [vmem:[#allocation7 + $0x38] sm:$0xff]   ;;  %v1078_v22 = vld [vmem:[#allocation8 + $0x20] sm:$0xff]   ;;  %s1210_s13 = scalar_lea.vmem %s1209_s9, 512  ;;  %p1211_p12 = scmp.lt.s32.totalorder %s1596_s21, %s1209_s9 }
  0x8c   : > { %917 = vmatpush3.bf16.msra.mxu0 %v1058_v2  ;;  %937 = vmatpush3.bf16.msra.mxu1 %v1067_v6  ;;  %v1076_v20 = vld [vmem:[#allocation8 + $0x10] sm:$0xff]   ;;  %v1077_v21 = vld [vmem:[#allocation8 + $0x18] sm:$0xff]   ;;  %v1079_v23 = vld [vmem:[#allocation8 + $0x28] sm:$0xff]   ;;  %p1206_p3 = pnand %p1205_p10, %p1485_p5  ;;  %p1212_p1 = scmp.lt.s32.totalorder %s1210_s13, %s1204_s30 }
  0x8d   : > { %918 = vmatprep.subr.bf16.mxu0 %v1286_v0  ;;  %938 = vmatprep.subr.bf16.mxu1 %v1286_v0  ;;  %v852_v24 = vld [vmem:[%s1647_s2] ss:$0 sm:$0xff]  ;;  %v1081_v35 = vld [vmem:[#allocation8 + $0x38] sm:$0xff]  }
  0x8e   : > { %v1080_v34 = vld [vmem:[#allocation8 + $0x30] sm:$0xff]   ;;  %p1207_p7 = pneg %p1206_p3  ;;  %p1213_p2 = por %p1212_p1, %p1211_p12 }
  0x8f   : > { %v862_v36 = vld [vmem:[%s1649_s4] ss:$0 sm:$0xff] }
  0x90   : > { %919 = vmatpush3.bf16.msra.mxu0 %v1059_v3  ;;  %939 = vmatpush3.bf16.msra.mxu1 %v1068_v8  ;;  %v871_v48 = vld [vmem:[%s1651_s6] ss:$0 sm:$0xff]  ;;  %p1214_p4 = pnand %p1213_p2, %p1207_p7 }
  0x91   : > { %920 = vmatprep.subr.bf16.mxu0 %v1286_v0  ;;  %940 = vmatprep.subr.bf16.mxu1 %v1286_v0 }
  0x94   : > { %921 = vmatpush3.bf16.msra.mxu0 %v1060_v5  ;;  %941 = vmatpush3.bf16.msra.mxu1 %v1069_v10 }
  0x95   : > { %922 = vmatprep.subr.bf16.mxu0 %v1286_v0  ;;  %942 = vmatprep.subr.bf16.mxu1 %v1286_v0 }
  0x98   : > { %923 = vmatpush3.bf16.msra.mxu0 %v1061_v7  ;;  %943 = vmatpush3.bf16.msra.mxu1 %v1070_v12 }
  0x99   : > { %924 = vmatprep.subr.bf16.mxu0 %v1286_v0  ;;  %944 = vmatprep.subr.bf16.mxu1 %v1286_v0 }
  0x9c   : > { %925 = vmatpush3.bf16.msra.mxu0 %v1062_v9  ;;  %945 = vmatpush3.bf16.msra.mxu1 %v1071_v14 }
  0x9d   : > { %926 = vmatprep.subr.bf16.mxu0 %v1286_v0  ;;  %946 = vmatprep.subr.bf16.mxu1 %v1286_v0 }
  0xa0   : > { %927 = vmatpush3.bf16.msra.mxu0 %v1063_v11  ;;  %947 = vmatpush3.bf16.msra.mxu1 %v1072_v16 }
  0xa1   : > { %928 = vmatprep.subr.bf16.mxu0 %v1286_v0  ;;  %948 = vmatprep.subr.bf16.mxu1 %v1286_v0 }
  0xa4   : > { %929 = vmatpush3.bf16.msra.mxu0 %v1064_v13  ;;  %949 = vmatpush3.bf16.msra.mxu1 %v1073_v17 }
  0xa5   : > { %954 = vmatprep.subr.bf16.mxu0 %v1286_v0 }
  0xa7   : > { %931 = vmatmul.mubr.bf16.vlgmr.msra.gmra.mrb[0].mxu0 %v1065_v15 }
  0xa8   : > { %970 = vmatprep.mubr.msk.bf16.mxu0 %vm1287_vm0, %v1286_v0  ;;  %955 = vmatpush3.bf16.msra.mxu0 %v1074_v18 }
  0xa9   : > { %956 = vmatprep.subr.bf16.mxu0 %v1286_v0 }
  0xac   : > { %957 = vmatpush3.bf16.msra.mxu0 %v1075_v19 }
  0xad   : > { %958 = vmatprep.subr.bf16.mxu0 %v1286_v0 }
  0xb0   : > { %959 = vmatpush3.bf16.msra.mxu0 %v1076_v20 }
  0xb1   : > { %960 = vmatprep.subr.bf16.mxu0 %v1286_v0 }
  0xb4   : > { %961 = vmatpush3.bf16.msra.mxu0 %v1077_v21 }
  0xb5   : > { %962 = vmatprep.subr.bf16.mxu0 %v1286_v0 }
  0xb8   : > { %963 = vmatpush3.bf16.msra.mxu0 %v1078_v22 }
  0xb9   : > { %964 = vmatprep.subr.bf16.mxu0 %v1286_v0 }
  0xbc   : > { %965 = vmatpush3.bf16.msra.mxu0 %v1079_v23 }
  0xbd   : > { %966 = vmatprep.subr.bf16.mxu0 %v1286_v0 }
  0xc0   : > { %967 = vmatpush3.bf16.msra.mxu0 %v1080_v34 }
  0xc1   : > { %968 = vmatprep.subr.bf16.mxu0 %v1286_v0 }
  0xc4   : > { %969 = vmatpush3.bf16.msra.mxu0 %v1081_v35 }
 0x17a   : > { %v457_v25 = vpop.f32.mrb[0].mxu0 }
 0x17b   : > { %v458_v26 = vadd.f32 %v852_v24, %v457_v25  ;;  %v932_v27 = vpop.f32.mrb[1].mxu0 }
 0x17c   : > { %v460_v28 = vpop.f32.mrb[2].mxu0 }
 0x17d   : > { %v461_v29 = vadd.f32 %v852_v24, %v460_v28  ;;  %v933_v30 = vpop.f32.mrb[3].mxu0  ;;  %v464_v31 = vmax.f32 %v458_v26, 0.0 }
 0x17f   : > { %v465_v32 = vmax.f32 %v461_v29, 0.0 }
 0x181   : > { %v466_v33 = vpack.c.bf16 %v465_v32, %v464_v31 }
 0x183   : > { %951 = vmatmul.mubr.bf16.vlgmr.msra.gmra.mrb[0].mxu1 %v466_v33 }
 0x256   : > { %v572_v37 = vpop.f32.mrb[0].mxu1 }
 0x257   : > { %v573_v38 = vadd.f32 %v862_v36, %v572_v37  ;;  %v952_v39 = vpop.f32.mrb[1].mxu1 }
 0x258   : > { %v575_v40 = vpop.f32.mrb[2].mxu1 }
 0x259   : > { %v576_v41 = vadd.f32 %v862_v36, %v575_v40  ;;  %v953_v42 = vpop.f32.mrb[3].mxu1  ;;  %v579_v43 = vmax.f32 %v573_v38, 0.0 }
 0x25b   : > { %v580_v44 = vmax.f32 %v576_v41, 0.0 }
 0x25d   : > { %v581_v45 = vpack.c.bf16 %v580_v44, %v579_v43 }
 0x25f   : > { %971 = vmatmul.mubr.bf16.vlgmr.msra.gmra.mrb[4].mxu0 %v581_v45 }
 0x332   : > { %v687_v49 = vpop.f32.mrb[4].mxu0 }
 0x333   : > { %v688_v50 = vadd.f32 %v871_v48, %v687_v49  ;;  %v972_v51 = vpop.f32.mrb[5].mxu0 }
 0x334   : > { %v690_v52 = vpop.f32.mrb[6].mxu0 }
 0x335   : > { %v691_v53 = vadd.f32 %v871_v48, %v690_v52  ;;  %v973_v54 = vpop.f32.mrb[7].mxu0  ;;  %v697_v55 = vsel %vm696_vm1, %v688_v50, -1e+30 }
 0x336   : > { %699 = vmax.xlane.f32.xlu0 %v697_v55 }
 0x337   : > { %v698_v56 = vsel %vm696_vm1, %v691_v53, -1e+30 }
 0x33a   : > { %701 = vmax.xlane.f32.xlu0 %v698_v56 }
 0x3c3   : > { %v700_v57 = vpop.xlane.xlu0 %699 }
 0x3c4   : > { %v703_v58 = vsub.f32 %v697_v55, %v700_v57 }
 0x3c6   : > { %v705_v59 = vmul.f32 1.442695, %v703_v58 }
 0x3c7   : > { %v702_v60 = vpop.xlane.xlu0 %701 }
 0x3c8   : > { %v704_v61 = vsub.f32 %v698_v56, %v702_v60  ;;  %1082 = vpow2.f32 %v705_v59 }
 0x3ca   : > { %v707_v62 = vmul.f32 1.442695, %v704_v61 }
 0x3cc   : > { %1084 = vpow2.f32 %v707_v62 }
 0x3d2   : > { %v1083_v63 = vpop.eup %1082 }
 0x3d3   : > { %709 = vadd.xlane.f32.xlu1 %v1083_v63 }
 0x3d6   : > { %v1085_v0 = vpop.eup %1084 }
 0x3d7   : > { %711 = vadd.xlane.f32.xlu1 %v1085_v0 }
 0x460   : > { %v710_v1 = vpop.xlane.xlu1 %709 }
 0x461   : > { %1086 = vlog2.f32 %v710_v1 }
 0x464   : > { %v712_v2 = vpop.xlane.xlu1 %711 }
 0x465   : > { %1088 = vlog2.f32 %v712_v2 }
 0x46b   : > { %v1087_v3 = vpop.eup %1086 }
 0x46c   : > { %v714_v4 = vmul.f32 0.6931472, %v1087_v3 }
 0x46e   : > { %v717_v5 = vsub.f32 %v703_v58, %v714_v4 }
 0x46f   : > { %v1089_v6 = vpop.eup %1088 }
 0x470   : > { %719 = vst [vmem:[%s340_s12] sm:$0xff] %v717_v5  ;;  %v716_v7 = vmul.f32 0.6931472, %v1089_v6 }
 0x472   : > { %v718_v8 = vsub.f32 %v704_v61, %v716_v7 }
 0x474   : > { %720 = vst [vmem:[%s340_s12 + $0x8] sm:$0xff] %v718_v8 }
 0x475   : > { %1217 = shalt.err (!%p1214_p4)
}
 0x476   : > { %s1218_s15 = scalar_lea.hbm %s1601_s11, 256  ;;  %s1222_s8 = scalar_lea.hbm %s1652_s7, 512 }
 0x477   : > { %p1219_p9 = scmp.ne.s32.totalorder %s1601_s11, %s1218_s15  ;;  %p1223_p8 = scmp.lt.u32.totalorder %s1601_s11, %s1652_s7 }
 0x478   : > { %p1224_p13 = scmp.lt.u32.totalorder %s1222_s8, %s1218_s15  ;;  %p1226_p10 = scmp.lt.u32.totalorder %s1218_s15, %s1601_s11 }
 0x479   : > { %p1220_p0 = pnand %p1219_p9, %p1485_p5 }
 0x47a   : > { %p1225_p6 = por %p1224_p13, %p1223_p8 }
 0x47b   : > { %p1221_p11 = pneg %p1220_p0 }
 0x47c   : > { %p1227_p3 = por %p1226_p10, %p1225_p6 }
 0x47e   : > { %p1228_p7 = pnand %p1227_p3, %p1221_p11 }
 0x480   : > { %1231 = shalt.err (!%p1228_p7)
}
 0x481   : > { %s1289_s29 = smov 128   ;;  %s1290_s23 = smov 8  }
 0x482   : > { %988 = dma.vmem_to_hbm [thread:$0]  (%p1485_p5), %s1596_s21, 256, %s1601_s11, %s722_s20, %s1289_s29, %s1289_s29, %s1290_s23  }
 0x483 PF: > { %s1672_s30 = sld [smem:[#allocation15_spill]]  ;;  %s750_s28 = sand.u32 1, %s1266_s24  }
 0x484   : > { %p1674_p1 = scmp.ge.s32.totalorder %s1278_s27, 2  ;;  %s751_s9 = scalar_lea.sflag [#allocation4], %s750_s28 }
 0x489   : > { %p1673_p12 = scmp.ne.s32.totalorder %s1672_s30, 0 }
 0x48b   : > { %p1005_p2 = pnand %p1674_p1, %p1673_p12 }
 0x48d   : > { %1261 = dma.done.wait (!%p1005_p2), %s751_s9, 256  }
 0x48e   : > { %1263 = vsyncadd (!%p1005_p2), %s751_s9, 4294967040  ;;  %p22_p4 = scmp.ge.s32.totalorder %s1471_s22, 4   ;;  %s1675_s24 = smov %s1270_s25 }
 0x48f   : > { %s1676_s25 = smov %s1274_s26  ;;  %s1677_s26 = smov %s1481_s18 }
 0x490   : > { %s1678_s27 = smov %s1471_s22  ;;  %24 = sbr.rel (!%p22_p4) target bundleno = 7 (0x7), region = 105 }
 0x497   :  { %756 = vsyncpa [#allocation3], 1 }
 0x498   :  { %758 = vsyncpa [#allocation3 + $0x1], 1 }
 0x499   :  { %759 = vsyncpa [#allocation6], 1 }
 0x49a   :  { %760 = vsyncpa [#allocation9], 1 }
 0x49b   :  { %761 = vsyncpa [#allocation4], 1 }
 0x49c   :  { %763 = vsyncpa [#allocation4 + $0x1], 1 }

</bundles_post_ra>
